<compile_context>
chip_gen: v7x
topology: tpu7x:2x2x1
jax: 0.10.0
libtpu: 0.0.40
codegen_flags: <defaults>
</compile_context>

<pallas_src>
import functools

import jax
import jax.numpy as jnp
import numpy as np
from jax.experimental import pallas as pl
from jax.experimental.pallas import tpu as pltpu


# ----------------------------- Pallas kernel ------------------------------ #

def _abcnn1_kernel(x1_ref, x2_ref, v1_ref, v2_ref, wk_ref, bias_ref,
                   out_ref, patch_ref, *, Wk):
    """One grid step == TB batch elements."""
    TB, L, D = x1_ref.shape
    K, F = wk_ref.shape
    Lpad = patch_ref.shape[1]            # Lout rounded up to a multiple of 8
    pad = Wk - 1
    Lout = L + pad
    P = out_ref.shape[2]                 # 2*L*F + 2*F

    x1 = x1_ref[...].astype(jnp.float32)                       # (TB, L, D)
    x2 = x2_ref[...].astype(jnp.float32)                       # (TB, L, D)
    v1 = v1_ref[...].astype(jnp.float32)                       # (L, D)
    v2 = v2_ref[...].astype(jnp.float32)                       # (L, D)
    wk = wk_ref[...].astype(jnp.float32)                       # (K, F)

    # ---- ABCNN-1 attention: A[i, j] = 1 / (1 + ||x1_i - x2_j||) ---------- #
    gram = jnp.einsum('bld,bmd->blm', x1, x2,
                      preferred_element_type=jnp.float32)      # (TB, L, L)
    sq1 = jnp.sum(x1 * x1, axis=-1, keepdims=True)             # (TB, L, 1)
    sq2 = jnp.sum(x2 * x2, axis=-1, keepdims=True)             # (TB, L, 1)
    d2 = jnp.maximum(sq1 + jnp.reshape(sq2, (TB, 1, L)) - 2.0 * gram, 0.0)
    den = 1.0 + jnp.sqrt(d2)
    # Reciprocal on the EUP (otherwise idle) + one Newton step for accuracy.
    r = pl.reciprocal(den, approx=True)
    A = r * (2.0 - den * r)                                    # (TB, L, L)
    # A^T via XLU transpose (review item 2) instead of recomputing gram/sqrt/rcp.
    At = jnp.swapaxes(A, -1, -2)                               # (TB, L, L)

    # ---- attention feature maps: rank-2 MXU matmuls (review item 1) ------ #
    attn1 = jnp.dot(A.reshape(TB * L, L), v1,
                    preferred_element_type=jnp.float32).reshape(TB, L, D)
    attn2 = jnp.dot(At.reshape(TB * L, L), v2,
                    preferred_element_type=jnp.float32).reshape(TB, L, D)

    # ---- im2col into the persistent VMEM scratch (review item 4) --------- #
    # Static zero borders: rewritten every step (tiny), so correctness does not
    # depend on pl.program_id(0)==0 init surviving a megacore grid split.
    for ci in range(2):
        for kh in range(Wk):
            cs = (ci * Wk + kh) * D
            top = pad - kh
            if top > 0:
                patch_ref[:, 0:top, cs:cs + D] = jnp.zeros(
                    (2 * TB, top, D), jnp.float32)
            bot0 = top + L
            if Lpad - bot0 > 0:
                patch_ref[:, bot0:Lpad, cs:cs + D] = jnp.zeros(
                    (2 * TB, Lpad - bot0, D), jnp.float32)

    # Data regions: sentence s occupies rows [s*TB, (s+1)*TB).
    # Column order (ch, kh, d) matches the wrapper's weight flattening.
    for s, (orig, attn) in enumerate(((x1, attn1), (x2, attn2))):
        for ci, ch in enumerate((orig, attn)):
            for kh in range(Wk):
                cs = (ci * Wk + kh) * D
                patch_ref[s * TB:(s + 1) * TB, pad - kh:pad - kh + L, cs:cs + D] = ch

    # ---- fused wide conv: one (2*TB*Lpad, K) @ (K, F) matmul (item 3) ----- #
    patches = patch_ref[...].reshape(2 * TB * Lpad, K)
    c = jnp.dot(patches, wk, preferred_element_type=jnp.float32)
    c = c.reshape(2 * TB, Lpad, F)                              # rows >= Lout are junk, unused

    # ---- pooling (bias added after pooling -- it is linear, review item) -- #
    wp = c[:, 0:L, :]
    for kh in range(1, Wk):                                     # static, Wk small
        wp = wp + c[:, kh:kh + L, :]
    wp = wp * (1.0 / Wk)                                        # (2*TB, L, F)  WidthAP (no bias yet)
    ap = jnp.sum(c[:, 0:Lout, :], axis=1, keepdims=True) * (1.0 / Lout)   # (2*TB, 1, F)  AllAP

    # TODO(synk): nn.Dropout2d(p=0.5) is a training-time stochastic op; identity in eval mode.

    # ---- lane-dense packed output: [wp1 | wp2 | ap1 | ap2] (items 9/10) --- #
    pieces = ([wp[0:TB, t:t + 1, :] for t in range(L)]
              + [wp[TB:2 * TB, t:t + 1, :] for t in range(L)]
              + [ap[0:TB], ap[TB:2 * TB]])
    packed = jnp.concatenate(pieces, axis=-1)                   # (TB, 1, P)
    out_ref[...] = (packed + bias_ref[...].reshape(1, 1, P)).astype(out_ref.dtype)


# ------------------------------- Wrapper ----------------------------------- #

def abcnn1_block(x1, x2, V1, V2, conv_w, conv_b, *, tb=None):
    """x1, x2: (B, 1, L, D) NCHW like PyTorch.  conv_w: (F, 2, Wk, D) OIHW.

    Returns (w1, w2, a1, a2) with PyTorch shapes w*: (B, 1, L, F), a*: (B, F).
    """
    B, _, L, D = x1.shape
    F, _, Wk, _ = conv_w.shape
    pad = Wk - 1
    Lout = L + pad
    Lpad = -(-Lout // 8) * 8            # sublane-aligned im2col length
    K = 2 * Wk * D
    P = 2 * L * F + 2 * F

    # Batch block: fill the MXU M dim (target TB*L ~ 256) but keep >= 2 grid steps
    # when B allows it so both v7x TensorCores get work (v5e/v6e: single TC, harmless).
    if tb is None:
        tb = max(8, -(-256 // L))
    TB = max(1, min(tb, -(-B // 2)))
    n_blk = -(-B // TB)
    Bp = n_blk * TB

    x1k = x1[:, 0].astype(jnp.float32)                          # (B, L, D)
    x2k = x2[:, 0].astype(jnp.float32)
    if Bp != B:
        padn = Bp - B
        x1k = jnp.concatenate([x1k, jnp.zeros((padn, L, D), x1k.dtype)], axis=0)
        x2k = jnp.concatenate([x2k, jnp.zeros((padn, L, D), x2k.dtype)], axis=0)

    # Conv weights flattened for the fused im2col matmul: (2, Wk, D, F) -> (2*Wk*D, F).
    wflat = jnp.transpose(conv_w, (1, 2, 3, 0)).reshape(K, F).astype(jnp.float32)
    # Bias pre-tiled to match the packed output layout [wp1(L*F) | wp2(L*F) | ap1(F) | ap2(F)].
    bias_packed = jnp.tile(conv_b.astype(jnp.float32), 2 * L + 2).reshape(1, P)

    kernel = functools.partial(_abcnn1_kernel, Wk=Wk)

    # VMEM footprint (f32, dominant terms): im2col scratch 2*TB*Lpad*K, double-buffered
    # x blocks 2*2*TB*L*D, packed output 2*TB*P, plus (TB,L,L) attention intermediates --
    # ~1-2 MiB at these sizes, far below the scoped-VMEM defaults (16 MiB v5e,
    # 32 MiB v6e/v7x), so vmem_limit_bytes is left at its default.  Re-derive against
    # v7x's 64 MiB physical / v5e's 16 MiB scoped before raising TB or L aggressively.
    packed = pl.pallas_call(
        kernel,
        out_shape=jax.ShapeDtypeStruct((Bp, 1, P), jnp.float32),
        grid=(n_blk,),
        in_specs=[
            pl.BlockSpec((TB, L, D), lambda b: (b, 0, 0)),       # x1
            pl.BlockSpec((TB, L, D), lambda b: (b, 0, 0)),       # x2
            # Grid-invariant operands (constant index maps -> DMA'd once).
            pl.BlockSpec((L, D), lambda b: (0, 0)),              # V1
            pl.BlockSpec((L, D), lambda b: (0, 0)),              # V2
            pl.BlockSpec((K, F), lambda b: (0, 0)),              # flattened conv weights
            pl.BlockSpec((1, P), lambda b: (0, 0)),              # packed conv bias
        ],
        out_specs=pl.BlockSpec((TB, 1, P), lambda b: (b, 0, 0)),
        scratch_shapes=[pltpu.VMEM((2 * TB, Lpad, K), jnp.float32)],
        compiler_params=pltpu.CompilerParams(
            dimension_semantics=("parallel",)),
    )(x1k, x2k, V1.astype(jnp.float32), V2.astype(jnp.float32), wflat, bias_packed)

    packed = packed[:B, 0]                                       # (B, P)
    LF = L * F
    w1 = packed[:, :LF].reshape(B, 1, L, F)
    w2 = packed[:, LF:2 * LF].reshape(B, 1, L, F)
    a1 = packed[:, 2 * LF:2 * LF + F]
    a2 = packed[:, 2 * LF + F:]
    return w1, w2, a1, a2


# --------------------------- Pure-JAX reference ----------------------------- #

def abcnn1_reference(x1, x2, V1, V2, conv_w, conv_b):
    B, _, L, D = x1.shape
    F, _, Wk, _ = conv_w.shape
    a, b = x1[:, 0], x2[:, 0]                               # (B, L, D)

    diff = a[:, :, None, :] - b[:, None, :, :]              # (B, L, L, D)
    dist = jnp.sqrt(jnp.sum(diff * diff, axis=-1))
    A = 1.0 / (1.0 + dist)                                  # (B, L, L)
    attn1 = jnp.einsum("bij,jd->bid", A, V1)
    attn2 = jnp.einsum("bij,id->bjd", A, V2)

    o1 = jnp.stack([a, attn1], axis=1)                      # (B, 2, L, D)
    o2 = jnp.stack([b, attn2], axis=1)

    def conv_pool(o):
        c = jax.lax.conv_general_dilated(
            o, conv_w, window_strides=(1, 1),
            padding=((Wk - 1, Wk - 1), (0, 0)),
            dimension_numbers=("NCHW", "OIHW", "NCHW"))     # (B, F, Lout, 1)
        c = c + conv_b[None, :, None, None]
        c = jnp.transpose(c, (0, 3, 2, 1))                  # (B, 1, Lout, F)
        wp = jnp.stack([c[:, :, t:t + Wk].mean(axis=2) for t in range(L)],
                       axis=2)                              # (B, 1, L, F)
        ap = c.mean(axis=2)[:, 0]                           # (B, F)
        return wp, ap

    w1, a1 = conv_pool(o1)
    w2, a2 = conv_pool(o2)
    return w1, w2, a1, a2


# --------------------------------- Main ------------------------------------ #

if __name__ == "__main__":
    B, L, D, F, Wk = 2, 8, 32, 16, 3

    key = jax.random.PRNGKey(0)
    k = jax.random.split(key, 6)
    x1 = jax.random.normal(k[0], (B, 1, L, D), jnp.float32)
    x2 = jax.random.normal(k[1], (B, 1, L, D), jnp.float32)
    # Attention feature-map weights (one per sentence), deterministic init.
    V1 = 0.1 * jax.random.normal(k[2], (L, D), jnp.float32)
    V2 = 0.1 * jax.random.normal(k[3], (L, D), jnp.float32)
    # Wide-conv parameters: Conv2d(in=2, out=F, kernel=(Wk, D)), OIHW layout.
    conv_w = 0.1 * jax.random.normal(k[4], (F, 2, Wk, D), jnp.float32)
    conv_b = 0.1 * jax.random.normal(k[5], (F,), jnp.float32)

    w1, w2, a1, a2 = abcnn1_block(x1, x2, V1, V2, conv_w, conv_b)
    jax.block_until_ready((w1, w2, a1, a2))

    rw1, rw2, ra1, ra2 = abcnn1_reference(x1, x2, V1, V2, conv_w, conv_b)
    np.testing.assert_allclose(np.asarray(w1), np.asarray(rw1), rtol=1e-3, atol=1e-3)
    np.testing.assert_allclose(np.asarray(w2), np.asarray(rw2), rtol=1e-3, atol=1e-3)
    np.testing.assert_allclose(np.asarray(a1), np.asarray(ra1), rtol=1e-3, atol=1e-3)
    np.testing.assert_allclose(np.asarray(a2), np.asarray(ra2), rtol=1e-3, atol=1e-3)

    assert w1.shape == (B, 1, L, F) and a1.shape == (B, F)
    print("KERNEL_OK")
</pallas_src>

<mosaic_0001>
module attributes {stable_mosaic.version = 11 : i64} {
  func.func @_abcnn1_kernel(%arg0: i32, %arg1: memref<1x8x32xf32, #tpu.memory_space<vmem>>, %arg2: memref<1x8x32xf32, #tpu.memory_space<vmem>>, %arg3: memref<8x32xf32, #tpu.memory_space<vmem>>, %arg4: memref<8x32xf32, #tpu.memory_space<vmem>>, %arg5: memref<192x16xf32, #tpu.memory_space<vmem>>, %arg6: memref<1x288xf32, #tpu.memory_space<vmem>>, %arg7: memref<1x1x288xf32, #tpu.memory_space<vmem>>, %arg8: memref<2x16x192xf32, #tpu.memory_space<vmem>>) attributes {dimension_semantics = [#tpu.dimension_semantics<parallel>], iteration_bounds = array<i64: 2>, scalar_prefetch = 0 : i64, scratch_operands = 1 : i64, tpu.core_type = #tpu.core_type<tc>, window_params = [{transform_indices = @transform_0, window_bounds = array<i64: 1, 8, 32>}, {transform_indices = @transform_1, window_bounds = array<i64: 1, 8, 32>}, {pipeline_mode = #tpu.pipeline_mode<synchronous>, transform_indices = @transform_2, window_bounds = array<i64: 8, 32>}, {pipeline_mode = #tpu.pipeline_mode<synchronous>, transform_indices = @transform_3, window_bounds = array<i64: 8, 32>}, {pipeline_mode = #tpu.pipeline_mode<synchronous>, transform_indices = @transform_4, window_bounds = array<i64: 192, 16>}, {pipeline_mode = #tpu.pipeline_mode<synchronous>, transform_indices = @transform_5, window_bounds = array<i64: 1, 288>}, {transform_indices = @transform_6, window_bounds = array<i64: 1, 1, 288>}]} {
    %c0 = arith.constant 0 : index
    %c0_0 = arith.constant 0 : index
    %c0_1 = arith.constant 0 : index
    %0 = vector.load %arg1[%c0, %c0_0, %c0_1] : memref<1x8x32xf32, #tpu.memory_space<vmem>>, vector<1x8x32xf32>
    %c0_2 = arith.constant 0 : index
    %c0_3 = arith.constant 0 : index
    %c0_4 = arith.constant 0 : index
    %1 = vector.load %arg2[%c0_2, %c0_3, %c0_4] : memref<1x8x32xf32, #tpu.memory_space<vmem>>, vector<1x8x32xf32>
    %c0_5 = arith.constant 0 : index
    %c0_6 = arith.constant 0 : index
    %2 = vector.load %arg3[%c0_5, %c0_6] : memref<8x32xf32, #tpu.memory_space<vmem>>, vector<8x32xf32>
    %c0_7 = arith.constant 0 : index
    %c0_8 = arith.constant 0 : index
    %3 = vector.load %arg4[%c0_7, %c0_8] : memref<8x32xf32, #tpu.memory_space<vmem>>, vector<8x32xf32>
    %c0_9 = arith.constant 0 : index
    %c0_10 = arith.constant 0 : index
    %4 = vector.load %arg5[%c0_9, %c0_10] : memref<192x16xf32, #tpu.memory_space<vmem>>, vector<192x16xf32>
    "tpu.trace_start"() <{level = 10 : i32, message = "bld,bmd->blm"}> : () -> ()
    %cst = arith.constant dense<0.000000e+00> : vector<1x8x8xf32>
    %5 = tpu.matmul %0, %1, %cst {dimension_numbers = #tpu.dot_dimension_numbers<[2], [2], [1], [1], [0, 0, 0, 1, 1, 1], [0], [0]>} : vector<1x8x32xf32>, vector<1x8x32xf32>, vector<1x8x8xf32> -> vector<1x8x8xf32>
    "tpu.trace_stop"() : () -> ()
    %6 = arith.mulf %0, %0 : vector<1x8x32xf32>
    %cst_11 = arith.constant dense<0.000000e+00> : vector<1x8xf32>
    %7 = vector.multi_reduction <add>, %6, %cst_11 [2] : vector<1x8x32xf32> to vector<1x8xf32>
    %8 = vector.shape_cast %7 : vector<1x8xf32> to vector<1x8x1xf32>
    %9 = arith.mulf %1, %1 : vector<1x8x32xf32>
    %cst_12 = arith.constant dense<0.000000e+00> : vector<1x8xf32>
    %10 = vector.multi_reduction <add>, %9, %cst_12 [2] : vector<1x8x32xf32> to vector<1x8xf32>
    %11 = vector.shape_cast %10 : vector<1x8xf32> to vector<1x8x1xf32>
    %12 = vector.shape_cast %11 : vector<1x8x1xf32> to vector<1x1x8xf32>
    %13 = vector.broadcast %8 : vector<1x8x1xf32> to vector<1x8x8xf32>
    %14 = vector.broadcast %12 : vector<1x1x8xf32> to vector<1x8x8xf32>
    %15 = arith.addf %13, %14 : vector<1x8x8xf32>
    %cst_13 = arith.constant 2.000000e+00 : f32
    %16 = vector.broadcast %cst_13 : f32 to vector<1x8x8xf32>
    %17 = arith.mulf %16, %5 : vector<1x8x8xf32>
    %18 = arith.subf %15, %17 : vector<1x8x8xf32>
    %cst_14 = arith.constant 0.000000e+00 : f32
    %19 = vector.broadcast %cst_14 : f32 to vector<1x8x8xf32>
    %20 = arith.maximumf %18, %19 : vector<1x8x8xf32>
    %21 = math.sqrt %20 : vector<1x8x8xf32>
    %cst_15 = arith.constant 1.000000e+00 : f32
    %22 = vector.broadcast %cst_15 : f32 to vector<1x8x8xf32>
    %23 = arith.addf %22, %21 : vector<1x8x8xf32>
    %24 = tpu.reciprocal %23 {approx = true} : vector<1x8x8xf32> -> vector<1x8x8xf32>
    %25 = arith.mulf %23, %24 : vector<1x8x8xf32>
    %cst_16 = arith.constant 2.000000e+00 : f32
    %26 = vector.broadcast %cst_16 : f32 to vector<1x8x8xf32>
    %27 = arith.subf %26, %25 : vector<1x8x8xf32>
    %28 = arith.mulf %24, %27 : vector<1x8x8xf32>
    %29 = tpu.transpose %28, [0, 2, 1] : vector<1x8x8xf32> -> vector<1x8x8xf32>
    %30 = vector.shape_cast %28 : vector<1x8x8xf32> to vector<8x8xf32>
    %cst_17 = arith.constant dense<0.000000e+00> : vector<8x32xf32>
    %31 = tpu.matmul %30, %2, %cst_17 {dimension_numbers = #tpu.dot_dimension_numbers<[1], [0], [0], [1], [0, 0, 1, 1], [], []>} : vector<8x8xf32>, vector<8x32xf32>, vector<8x32xf32> -> vector<8x32xf32>
    %32 = vector.shape_cast %31 : vector<8x32xf32> to vector<1x8x32xf32>
    %33 = vector.shape_cast %29 : vector<1x8x8xf32> to vector<8x8xf32>
    %cst_18 = arith.constant dense<0.000000e+00> : vector<8x32xf32>
    %34 = tpu.matmul %33, %3, %cst_18 {dimension_numbers = #tpu.dot_dimension_numbers<[1], [0], [0], [1], [0, 0, 1, 1], [], []>} : vector<8x8xf32>, vector<8x32xf32>, vector<8x32xf32> -> vector<8x32xf32>
    %35 = vector.shape_cast %34 : vector<8x32xf32> to vector<1x8x32xf32>
    %cst_19 = arith.constant 0.000000e+00 : f32
    %36 = vector.broadcast %cst_19 : f32 to vector<2x2x32xf32>
    %c0_20 = arith.constant 0 : index
    %c0_21 = arith.constant 0 : index
    %c0_22 = arith.constant 0 : index
    %37 = vector.load %arg8[%c0_20, %c0_21, %c0_22] : memref<2x16x192xf32, #tpu.memory_space<vmem>>, vector<2x2x32xf32>
    tpu.vector_store %arg8[%c0_20, %c0_21, %c0_22], %36 {strides = array<i32>} : memref<2x16x192xf32, #tpu.memory_space<vmem>>, vector<2x2x32xf32>,
    %cst_23 = arith.constant 0.000000e+00 : f32
    %38 = vector.broadcast %cst_23 : f32 to vector<2x6x32xf32>
    %c0_24 = arith.constant 0 : index
    %c10 = arith.constant 10 : index
    %c0_25 = arith.constant 0 : index
    %39 = vector.load %arg8[%c0_24, %c10, %c0_25] : memref<2x16x192xf32, #tpu.memory_space<vmem>>, vector<2x6x32xf32>
    tpu.vector_store %arg8[%c0_24, %c10, %c0_25], %38 {strides = array<i32>} : memref<2x16x192xf32, #tpu.memory_space<vmem>>, vector<2x6x32xf32>,
    %cst_26 = arith.constant 0.000000e+00 : f32
    %40 = vector.broadcast %cst_26 : f32 to vector<2x1x32xf32>
    %c0_27 = arith.constant 0 : index
    %c0_28 = arith.constant 0 : index
    %c32 = arith.constant 32 : index
    %41 = vector.load %arg8[%c0_27, %c0_28, %c32] : memref<2x16x192xf32, #tpu.memory_space<vmem>>, vector<2x1x32xf32>
    tpu.vector_store %arg8[%c0_27, %c0_28, %c32], %40 {strides = array<i32>} : memref<2x16x192xf32, #tpu.memory_space<vmem>>, vector<2x1x32xf32>,
    %cst_29 = arith.constant 0.000000e+00 : f32
    %42 = vector.broadcast %cst_29 : f32 to vector<2x7x32xf32>
    %c0_30 = arith.constant 0 : index
    %c9 = arith.constant 9 : index
    %c32_31 = arith.constant 32 : index
    %43 = vector.load %arg8[%c0_30, %c9, %c32_31] : memref<2x16x192xf32, #tpu.memory_space<vmem>>, vector<2x7x32xf32>
    tpu.vector_store %arg8[%c0_30, %c9, %c32_31], %42 {strides = array<i32>} : memref<2x16x192xf32, #tpu.memory_space<vmem>>, vector<2x7x32xf32>,
    %cst_32 = arith.constant 0.000000e+00 : f32
    %44 = vector.broadcast %cst_32 : f32 to vector<2x8x32xf32>
    %c0_33 = arith.constant 0 : index
    %c8 = arith.constant 8 : index
    %c64 = arith.constant 64 : index
    %45 = vector.load %arg8[%c0_33, %c8, %c64] : memref<2x16x192xf32, #tpu.memory_space<vmem>>, vector<2x8x32xf32>
    tpu.vector_store %arg8[%c0_33, %c8, %c64], %44 {strides = array<i32>} : memref<2x16x192xf32, #tpu.memory_space<vmem>>, vector<2x8x32xf32>,
    %cst_34 = arith.constant 0.000000e+00 : f32
    %46 = vector.broadcast %cst_34 : f32 to vector<2x2x32xf32>
    %c0_35 = arith.constant 0 : index
    %c0_36 = arith.constant 0 : index
    %c96 = arith.constant 96 : index
    %47 = vector.load %arg8[%c0_35, %c0_36, %c96] : memref<2x16x192xf32, #tpu.memory_space<vmem>>, vector<2x2x32xf32>
    tpu.vector_store %arg8[%c0_35, %c0_36, %c96], %46 {strides = array<i32>} : memref<2x16x192xf32, #tpu.memory_space<vmem>>, vector<2x2x32xf32>,
    %cst_37 = arith.constant 0.000000e+00 : f32
    %48 = vector.broadcast %cst_37 : f32 to vector<2x6x32xf32>
    %c0_38 = arith.constant 0 : index
    %c10_39 = arith.constant 10 : index
    %c96_40 = arith.constant 96 : index
    %49 = vector.load %arg8[%c0_38, %c10_39, %c96_40] : memref<2x16x192xf32, #tpu.memory_space<vmem>>, vector<2x6x32xf32>
    tpu.vector_store %arg8[%c0_38, %c10_39, %c96_40], %48 {strides = array<i32>} : memref<2x16x192xf32, #tpu.memory_space<vmem>>, vector<2x6x32xf32>,
    %cst_41 = arith.constant 0.000000e+00 : f32
    %50 = vector.broadcast %cst_41 : f32 to vector<2x1x32xf32>
    %c0_42 = arith.constant 0 : index
    %c0_43 = arith.constant 0 : index
    %c128 = arith.constant 128 : index
    %51 = vector.load %arg8[%c0_42, %c0_43, %c128] : memref<2x16x192xf32, #tpu.memory_space<vmem>>, vector<2x1x32xf32>
    tpu.vector_store %arg8[%c0_42, %c0_43, %c128], %50 {strides = array<i32>} : memref<2x16x192xf32, #tpu.memory_space<vmem>>, vector<2x1x32xf32>,
    %cst_44 = arith.constant 0.000000e+00 : f32
    %52 = vector.broadcast %cst_44 : f32 to vector<2x7x32xf32>
    %c0_45 = arith.constant 0 : index
    %c9_46 = arith.constant 9 : index
    %c128_47 = arith.constant 128 : index
    %53 = vector.load %arg8[%c0_45, %c9_46, %c128_47] : memref<2x16x192xf32, #tpu.memory_space<vmem>>, vector<2x7x32xf32>
    tpu.vector_store %arg8[%c0_45, %c9_46, %c128_47], %52 {strides = array<i32>} : memref<2x16x192xf32, #tpu.memory_space<vmem>>, vector<2x7x32xf32>,
    %cst_48 = arith.constant 0.000000e+00 : f32
    %54 = vector.broadcast %cst_48 : f32 to vector<2x8x32xf32>
    %c0_49 = arith.constant 0 : index
    %c8_50 = arith.constant 8 : index
    %c160 = arith.constant 160 : index
    %55 = vector.load %arg8[%c0_49, %c8_50, %c160] : memref<2x16x192xf32, #tpu.memory_space<vmem>>, vector<2x8x32xf32>
    tpu.vector_store %arg8[%c0_49, %c8_50, %c160], %54 {strides = array<i32>} : memref<2x16x192xf32, #tpu.memory_space<vmem>>, vector<2x8x32xf32>,
    %c0_51 = arith.constant 0 : index
    %c2 = arith.constant 2 : index
    %c0_52 = arith.constant 0 : index
    %56 = vector.load %arg8[%c0_51, %c2, %c0_52] : memref<2x16x192xf32, #tpu.memory_space<vmem>>, vector<1x8x32xf32>
    tpu.vector_store %arg8[%c0_51, %c2, %c0_52], %0 {strides = array<i32>} : memref<2x16x192xf32, #tpu.memory_space<vmem>>, vector<1x8x32xf32>,
    %c0_53 = arith.constant 0 : index
    %c1 = arith.constant 1 : index
    %c32_54 = arith.constant 32 : index
    %57 = vector.load %arg8[%c0_53, %c1, %c32_54] : memref<2x16x192xf32, #tpu.memory_space<vmem>>, vector<1x8x32xf32>
    tpu.vector_store %arg8[%c0_53, %c1, %c32_54], %0 {strides = array<i32>} : memref<2x16x192xf32, #tpu.memory_space<vmem>>, vector<1x8x32xf32>,
    %c0_55 = arith.constant 0 : index
    %c0_56 = arith.constant 0 : index
    %c64_57 = arith.constant 64 : index
    %58 = vector.load %arg8[%c0_55, %c0_56, %c64_57] : memref<2x16x192xf32, #tpu.memory_space<vmem>>, vector<1x8x32xf32>
    tpu.vector_store %arg8[%c0_55, %c0_56, %c64_57], %0 {strides = array<i32>} : memref<2x16x192xf32, #tpu.memory_space<vmem>>, vector<1x8x32xf32>,
    %c0_58 = arith.constant 0 : index
    %c2_59 = arith.constant 2 : index
    %c96_60 = arith.constant 96 : index
    %59 = vector.load %arg8[%c0_58, %c2_59, %c96_60] : memref<2x16x192xf32, #tpu.memory_space<vmem>>, vector<1x8x32xf32>
    tpu.vector_store %arg8[%c0_58, %c2_59, %c96_60], %32 {strides = array<i32>} : memref<2x16x192xf32, #tpu.memory_space<vmem>>, vector<1x8x32xf32>,
    %c0_61 = arith.constant 0 : index
    %c1_62 = arith.constant 1 : index
    %c128_63 = arith.constant 128 : index
    %60 = vector.load %arg8[%c0_61, %c1_62, %c128_63] : memref<2x16x192xf32, #tpu.memory_space<vmem>>, vector<1x8x32xf32>
    tpu.vector_store %arg8[%c0_61, %c1_62, %c128_63], %32 {strides = array<i32>} : memref<2x16x192xf32, #tpu.memory_space<vmem>>, vector<1x8x32xf32>,
    %c0_64 = arith.constant 0 : index
    %c0_65 = arith.constant 0 : index
    %c160_66 = arith.constant 160 : index
    %61 = vector.load %arg8[%c0_64, %c0_65, %c160_66] : memref<2x16x192xf32, #tpu.memory_space<vmem>>, vector<1x8x32xf32>
    tpu.vector_store %arg8[%c0_64, %c0_65, %c160_66], %32 {strides = array<i32>} : memref<2x16x192xf32, #tpu.memory_space<vmem>>, vector<1x8x32xf32>,
    %c1_67 = arith.constant 1 : index
    %c2_68 = arith.constant 2 : index
    %c0_69 = arith.constant 0 : index
    %62 = vector.load %arg8[%c1_67, %c2_68, %c0_69] : memref<2x16x192xf32, #tpu.memory_space<vmem>>, vector<1x8x32xf32>
    tpu.vector_store %arg8[%c1_67, %c2_68, %c0_69], %1 {strides = array<i32>} : memref<2x16x192xf32, #tpu.memory_space<vmem>>, vector<1x8x32xf32>,
    %c1_70 = arith.constant 1 : index
    %c1_71 = arith.constant 1 : index
    %c32_72 = arith.constant 32 : index
    %63 = vector.load %arg8[%c1_70, %c1_71, %c32_72] : memref<2x16x192xf32, #tpu.memory_space<vmem>>, vector<1x8x32xf32>
    tpu.vector_store %arg8[%c1_70, %c1_71, %c32_72], %1 {strides = array<i32>} : memref<2x16x192xf32, #tpu.memory_space<vmem>>, vector<1x8x32xf32>,
    %c1_73 = arith.constant 1 : index
    %c0_74 = arith.constant 0 : index
    %c64_75 = arith.constant 64 : index
    %64 = vector.load %arg8[%c1_73, %c0_74, %c64_75] : memref<2x16x192xf32, #tpu.memory_space<vmem>>, vector<1x8x32xf32>
    tpu.vector_store %arg8[%c1_73, %c0_74, %c64_75], %1 {strides = array<i32>} : memref<2x16x192xf32, #tpu.memory_space<vmem>>, vector<1x8x32xf32>,
    %c1_76 = arith.constant 1 : index
    %c2_77 = arith.constant 2 : index
    %c96_78 = arith.constant 96 : index
    %65 = vector.load %arg8[%c1_76, %c2_77, %c96_78] : memref<2x16x192xf32, #tpu.memory_space<vmem>>, vector<1x8x32xf32>
    tpu.vector_store %arg8[%c1_76, %c2_77, %c96_78], %35 {strides = array<i32>} : memref<2x16x192xf32, #tpu.memory_space<vmem>>, vector<1x8x32xf32>,
    %c1_79 = arith.constant 1 : index
    %c1_80 = arith.constant 1 : index
    %c128_81 = arith.constant 128 : index
    %66 = vector.load %arg8[%c1_79, %c1_80, %c128_81] : memref<2x16x192xf32, #tpu.memory_space<vmem>>, vector<1x8x32xf32>
    tpu.vector_store %arg8[%c1_79, %c1_80, %c128_81], %35 {strides = array<i32>} : memref<2x16x192xf32, #tpu.memory_space<vmem>>, vector<1x8x32xf32>,
    %c1_82 = arith.constant 1 : index
    %c0_83 = arith.constant 0 : index
    %c160_84 = arith.constant 160 : index
    %67 = vector.load %arg8[%c1_82, %c0_83, %c160_84] : memref<2x16x192xf32, #tpu.memory_space<vmem>>, vector<1x8x32xf32>
    tpu.vector_store %arg8[%c1_82, %c0_83, %c160_84], %35 {strides = array<i32>} : memref<2x16x192xf32, #tpu.memory_space<vmem>>, vector<1x8x32xf32>,
    %c0_85 = arith.constant 0 : index
    %c0_86 = arith.constant 0 : index
    %c0_87 = arith.constant 0 : index
    %68 = vector.load %arg8[%c0_85, %c0_86, %c0_87] : memref<2x16x192xf32, #tpu.memory_space<vmem>>, vector<2x16x192xf32>
    %69 = vector.shape_cast %68 : vector<2x16x192xf32> to vector<32x192xf32>
    %cst_88 = arith.constant dense<0.000000e+00> : vector<32x16xf32>
    %70 = tpu.matmul %69, %4, %cst_88 {dimension_numbers = #tpu.dot_dimension_numbers<[1], [0], [0], [1], [0, 0, 1, 1], [], []>} : vector<32x192xf32>, vector<192x16xf32>, vector<32x16xf32> -> vector<32x16xf32>
    %71 = vector.shape_cast %70 : vector<32x16xf32> to vector<2x16x16xf32>
    %72 = vector.extract_strided_slice %71 {offsets = [0, 0, 0], sizes = [2, 8, 16], strides = [1, 1, 1]} : vector<2x16x16xf32> to vector<2x8x16xf32>
    %73 = vector.extract_strided_slice %71 {offsets = [0, 1, 0], sizes = [2, 8, 16], strides = [1, 1, 1]} : vector<2x16x16xf32> to vector<2x8x16xf32>
    %74 = arith.addf %72, %73 : vector<2x8x16xf32>
    %75 = vector.extract_strided_slice %71 {offsets = [0, 2, 0], sizes = [2, 8, 16], strides = [1, 1, 1]} : vector<2x16x16xf32> to vector<2x8x16xf32>
    %76 = arith.addf %74, %75 : vector<2x8x16xf32>
    %cst_89 = arith.constant 0.333333343 : f32
    %77 = vector.broadcast %cst_89 : f32 to vector<2x8x16xf32>
    %78 = arith.mulf %76, %77 : vector<2x8x16xf32>
    %79 = vector.extract_strided_slice %71 {offsets = [0, 0, 0], sizes = [2, 10, 16], strides = [1, 1, 1]} : vector<2x16x16xf32> to vector<2x10x16xf32>
    %cst_90 = arith.constant dense<0.000000e+00> : vector<2x16xf32>
    %80 = vector.multi_reduction <add>, %79, %cst_90 [1] : vector<2x10x16xf32> to vector<2x16xf32>
    %81 = vector.shape_cast %80 : vector<2x16xf32> to vector<2x1x16xf32>
    %cst_91 = arith.constant 1.000000e-01 : f32
    %82 = vector.broadcast %cst_91 : f32 to vector<2x1x16xf32>
    %83 = arith.mulf %81, %82 : vector<2x1x16xf32>
    %84 = vector.extract_strided_slice %78 {offsets = [0, 0, 0], sizes = [1, 1, 16], strides = [1, 1, 1]} : vector<2x8x16xf32> to vector<1x1x16xf32>
    %85 = vector.extract_strided_slice %78 {offsets = [0, 1, 0], sizes = [1, 1, 16], strides = [1, 1, 1]} : vector<2x8x16xf32> to vector<1x1x16xf32>
    %86 = vector.extract_strided_slice %78 {offsets = [0, 2, 0], sizes = [1, 1, 16], strides = [1, 1, 1]} : vector<2x8x16xf32> to vector<1x1x16xf32>
    %87 = vector.extract_strided_slice %78 {offsets = [0, 3, 0], sizes = [1, 1, 16], strides = [1, 1, 1]} : vector<2x8x16xf32> to vector<1x1x16xf32>
    %88 = vector.extract_strided_slice %78 {offsets = [0, 4, 0], sizes = [1, 1, 16], strides = [1, 1, 1]} : vector<2x8x16xf32> to vector<1x1x16xf32>
    %89 = vector.extract_strided_slice %78 {offsets = [0, 5, 0], sizes = [1, 1, 16], strides = [1, 1, 1]} : vector<2x8x16xf32> to vector<1x1x16xf32>
    %90 = vector.extract_strided_slice %78 {offsets = [0, 6, 0], sizes = [1, 1, 16], strides = [1, 1, 1]} : vector<2x8x16xf32> to vector<1x1x16xf32>
    %91 = vector.extract_strided_slice %78 {offsets = [0, 7, 0], sizes = [1, 1, 16], strides = [1, 1, 1]} : vector<2x8x16xf32> to vector<1x1x16xf32>
    %92 = vector.extract_strided_slice %78 {offsets = [1, 0, 0], sizes = [1, 1, 16], strides = [1, 1, 1]} : vector<2x8x16xf32> to vector<1x1x16xf32>
    %93 = vector.extract_strided_slice %78 {offsets = [1, 1, 0], sizes = [1, 1, 16], strides = [1, 1, 1]} : vector<2x8x16xf32> to vector<1x1x16xf32>
    %94 = vector.extract_strided_slice %78 {offsets = [1, 2, 0], sizes = [1, 1, 16], strides = [1, 1, 1]} : vector<2x8x16xf32> to vector<1x1x16xf32>
    %95 = vector.extract_strided_slice %78 {offsets = [1, 3, 0], sizes = [1, 1, 16], strides = [1, 1, 1]} : vector<2x8x16xf32> to vector<1x1x16xf32>
    %96 = vector.extract_strided_slice %78 {offsets = [1, 4, 0], sizes = [1, 1, 16], strides = [1, 1, 1]} : vector<2x8x16xf32> to vector<1x1x16xf32>
    %97 = vector.extract_strided_slice %78 {offsets = [1, 5, 0], sizes = [1, 1, 16], strides = [1, 1, 1]} : vector<2x8x16xf32> to vector<1x1x16xf32>
    %98 = vector.extract_strided_slice %78 {offsets = [1, 6, 0], sizes = [1, 1, 16], strides = [1, 1, 1]} : vector<2x8x16xf32> to vector<1x1x16xf32>
    %99 = vector.extract_strided_slice %78 {offsets = [1, 7, 0], sizes = [1, 1, 16], strides = [1, 1, 1]} : vector<2x8x16xf32> to vector<1x1x16xf32>
    %100 = vector.extract_strided_slice %83 {offsets = [0, 0, 0], sizes = [1, 1, 16], strides = [1, 1, 1]} : vector<2x1x16xf32> to vector<1x1x16xf32>
    %101 = vector.extract_strided_slice %83 {offsets = [1, 0, 0], sizes = [1, 1, 16], strides = [1, 1, 1]} : vector<2x1x16xf32> to vector<1x1x16xf32>
    %102 = tpu.concatenate %84, %85, %86, %87, %88, %89, %90, %91, %92, %93, %94, %95, %96, %97, %98, %99 in 2 : vector<1x1x16xf32>, vector<1x1x16xf32>, vector<1x1x16xf32>, vector<1x1x16xf32>, vector<1x1x16xf32>, vector<1x1x16xf32>, vector<1x1x16xf32>, vector<1x1x16xf32>, vector<1x1x16xf32>, vector<1x1x16xf32>, vector<1x1x16xf32>, vector<1x1x16xf32>, vector<1x1x16xf32>, vector<1x1x16xf32>, vector<1x1x16xf32>, vector<1x1x16xf32> -> vector<1x1x256xf32>
    %103 = tpu.concatenate %100, %101 in 2 : vector<1x1x16xf32>, vector<1x1x16xf32> -> vector<1x1x32xf32>
    %104 = tpu.concatenate %102, %103 in 2 : vector<1x1x256xf32>, vector<1x1x32xf32> -> vector<1x1x288xf32>
    %c0_92 = arith.constant 0 : index
    %c0_93 = arith.constant 0 : index
    %105 = vector.load %arg6[%c0_92, %c0_93] : memref<1x288xf32, #tpu.memory_space<vmem>>, vector<1x288xf32>
    %106 = vector.shape_cast %105 : vector<1x288xf32> to vector<1x1x288xf32>
    %107 = arith.addf %104, %106 : vector<1x1x288xf32>
    %c0_94 = arith.constant 0 : index
    %c0_95 = arith.constant 0 : index
    %c0_96 = arith.constant 0 : index
    %108 = vector.load %arg7[%c0_94, %c0_95, %c0_96] : memref<1x1x288xf32, #tpu.memory_space<vmem>>, vector<1x1x288xf32>
    tpu.vector_store %arg7[%c0_94, %c0_95, %c0_96], %107 {strides = array<i32>} : memref<1x1x288xf32, #tpu.memory_space<vmem>>, vector<1x1x288xf32>,
    return
  }
  func.func @transform_0(%arg0: i32) -> (i32, i32, i32) {
    %c0_i32 = arith.constant 0 : i32
    %c0_i32_0 = arith.constant 0 : i32
    %c0_i32_1 = arith.constant 0 : i32
    return %arg0, %c0_i32, %c0_i32_0 : i32, i32, i32
  }
  func.func @transform_1(%arg0: i32) -> (i32, i32, i32) {
    %c0_i32 = arith.constant 0 : i32
    %c0_i32_0 = arith.constant 0 : i32
    %c0_i32_1 = arith.constant 0 : i32
    return %arg0, %c0_i32, %c0_i32_0 : i32, i32, i32
  }
  func.func @transform_2(%arg0: i32) -> (i32, i32) {
    %c0_i32 = arith.constant 0 : i32
    %c0_i32_0 = arith.constant 0 : i32
    %c0_i32_1 = arith.constant 0 : i32
    return %c0_i32, %c0_i32_0 : i32, i32
  }
  func.func @transform_3(%arg0: i32) -> (i32, i32) {
    %c0_i32 = arith.constant 0 : i32
    %c0_i32_0 = arith.constant 0 : i32
    %c0_i32_1 = arith.constant 0 : i32
    return %c0_i32, %c0_i32_0 : i32, i32
  }
  func.func @transform_4(%arg0: i32) -> (i32, i32) {
    %c0_i32 = arith.constant 0 : i32
    %c0_i32_0 = arith.constant 0 : i32
    %c0_i32_1 = arith.constant 0 : i32
    return %c0_i32, %c0_i32_0 : i32, i32
  }
  func.func @transform_5(%arg0: i32) -> (i32, i32) {
    %c0_i32 = arith.constant 0 : i32
    %c0_i32_0 = arith.constant 0 : i32
    %c0_i32_1 = arith.constant 0 : i32
    return %c0_i32, %c0_i32_0 : i32, i32
  }
  func.func @transform_6(%arg0: i32) -> (i32, i32, i32) {
    %c0_i32 = arith.constant 0 : i32
    %c0_i32_0 = arith.constant 0 : i32
    %c0_i32_1 = arith.constant 0 : i32
    return %arg0, %c0_i32, %c0_i32_0 : i32, i32, i32
  }
}

</mosaic_0001>

<bundles_post_ra>
// kernel: tpu_custom_call.1
= control target key start
LH: loop header
LB: loop body
LE: loop exit
PB: predicated region body
PF: predicated region fallthrough
CT: control target
= control target key end

     0   :  { %11 = vsyncpa [#allocation4], 0  ;;  %s1658_s0 = inlined_call_operand.vmem [shape: f32[2,8,32], index: 0, kind: input, shape index: {}]   ;;  %s1659_s1 = inlined_call_operand.vmem [shape: f32[2,8,32], index: 1, kind: input, shape index: {}]   ;;  %s1660_s2 = inlined_call_operand.vmem [shape: f32[8,32], index: 2, kind: input, shape index: {}]   ;;  %s1661_s3 = inlined_call_operand.vmem [shape: f32[8,32], index: 3, kind: input, shape index: {}]   ;;  %s1662_s4 = inlined_call_operand.vmem [shape: f32[192,16], index: 4, kind: input, shape index: {}]   ;;  %s1663_s5 = inlined_call_operand.vmem [shape: f32[1,288], index: 5, kind: input, shape index: {}]   ;;  %s1664_s6 = inlined_call_operand.hbm [shape: f32[2,1,288], index: 6, kind: output, shape index: {}]  }
   0x1   :  { %13 = vsyncpa [#allocation4 + $0x1], 0  ;;  %s1297_s21 = smov 0   ;;  %s1299_s22 = smov 0  }
   0x2   :  { %s1301_s23 = smov 0   ;;  %s1303_s24 = smov 0  }
   0x3 LB: > { %s1318_s25 = sadd.s32 4294967295, %s1248_s24   ;;  %s1056_s26 = sadd.s32 4294967294, %s1248_s24   ;;  %s1248_s24 = sphi %s1303_s24, %s1670_s24   ;;  %s1244_s23 = sphi %s1301_s23, %s1669_s23   ;;  %s1240_s22 = sphi %s1299_s22, %s1668_s22   ;;  %s1236_s21 = sphi %s1297_s21, %s1667_s21  }
   0x4   : > { %s1322_s27 = sadd.s32 1, %s1248_s24   ;;  %s162_s28 = sadd.s32 1, %s1244_s23 }
   0x5   : > { %s159_s29 = ssub.s32 %s1248_s24, %s1322_s27  ;;  %p172_p0 = scmp.ne.s32.totalorder %s1244_s23, %s1240_s22 }
   0x6   : > { %p160_p1 = scmp.eq.s32.totalorder %s159_s29, 0  ;;  %p173_p2 = scmp.eq.s32.totalorder %s1318_s25, 1 }
   0x7   : > { %p178_p3 = scmp.ne.s32.totalorder %s1240_s22, %s1236_s21  ;;  %p179_p4 = scmp.eq.s32.totalorder %s1056_s26, 1 }
   0x8   : > { %s1333_s30 = scalar_select %p160_p1, %s1244_s23, %s162_s28  }
   0x9   : > { %p1335_p5 = por %p173_p2, %p172_p0  ;;  %p1339_p6 = por %p179_p4, %p178_p3 }
   0xa   : > { %p1059_p7 = scmp.ge.s32.totalorder %s1248_s24, 1  ;;  %p223_p8 = scmp.lt.s32.totalorder %s1248_s24, 3 }
   0xc   : > { %p224_p9 = pnand %p1059_p7, %p223_p8 }
   0xd   : > { %p256_p10 = scmp.lt.s32.totalorder (!%p224_p9), %s1318_s25, 1  ;;  %v1250_v0 = vmov (!%p224_p9), 0.0   ;;  %vm1251_vm0 = vmmov (!%p224_p9), 0   ;;  %vm292_vm1 = vcmask (!%p224_p9), 261120   ;;  %v266_v7 = vld [vmem:[%s1660_s2] sm:$0xff] (!%p224_p9)  ;;  %v378_v8 = vlaneseq (!%p224_p9)  ;;  %s1252_s26 = smov (!%p224_p9), 64  }
   0xe   : > { %227 = sbr.rel (%p224_p9) target bundleno = 1138 (0x472), region = 44  ;;  %1079 = vmatprep.subr.mxu1 (!%p224_p9), %v1250_v0  ;;  %1081 = vmatprep.mubr.msk.f32.mxu1 (!%p224_p9), %vm1251_vm0, %v1250_v0  ;;  %vm445_vm4 = vcmask (!%p224_p9), 64512   ;;  %v267_v31 = vld [vmem:[%s1661_s3] sm:$0xff] (!%p224_p9)  ;;  %vm616_vm5 = vcmask (!%p224_p9), 261121   ;;  %vm619_vm6 = vcmask (!%p224_p9), 523520   ;;  %vm613_vm7 = vcmask (!%p224_p9), 253952  }
   0xf   : > { %v379_v9 = vand.u32 (!%p224_p9), 127, %v378_v8  ;;  %v1379_v10 = vshrl.u32 (!%p224_p9), %v378_v8, 7  ;;  %617 = vst.msk [vmem:[#allocation2 + $0x18] sm:$0xfe] (!%p224_p9), %vm616_vm5, %v1250_v0  ;;  %618 = vst.msk [vmem:[#allocation2 + $0x38] sm:$0xfe] (!%p224_p9), %vm616_vm5, %v1250_v0 }
  0x10   : > { %620 = vst.msk [vmem:[#allocation2 + $0x18] sm:$0xff] (!%p224_p9), %vm619_vm6, %v1250_v0  ;;  %621 = vst.msk [vmem:[#allocation2 + $0x38] sm:$0xff] (!%p224_p9), %vm619_vm6, %v1250_v0  ;;  %s1253_s28 = smov (!%p224_p9), 32   ;;  %v268_v33 = vld [vmem:[%s1662_s4] sm:$0xff] (!%p224_p9)  ;;  %v269_v34 = vld [vmem:[%s1662_s4 + $0x8] sm:$0xff] (!%p224_p9)  ;;  %v1254_v36 = vmov (!%p224_p9), 0.0|0.0  }
  0x11   : > { %v382_v12 = vsub.s32 (!%p224_p9), %v379_v9, %v1379_v10  ;;  %614 = vst.msk [vmem:[#allocation2 + $0x8] sm:$0x1] (!%p224_p9), %vm613_vm7, %v1250_v0  ;;  %615 = vst.msk [vmem:[#allocation2 + $0x28] sm:$0x1] (!%p224_p9), %vm613_vm7, %v1250_v0  ;;  %v270_v35 = vld [vmem:[%s1662_s4 + $0x10] sm:$0xff] (!%p224_p9)  ;;  %1094 = vmatprep.subr.bf16.mxu0 (!%p224_p9), %v1254_v36  ;;  %v1095_v37 = vpack.c.bf16 (!%p224_p9), %v269_v34, %v268_v33  ;;  %v271_v38 = vld [vmem:[%s1662_s4 + $0x18] sm:$0xff] (!%p224_p9) }
  0x12   : > { %v1098_v39 = vpack.c.bf16 (!%p224_p9), %v271_v38, %v270_v35  ;;  %v272_v40 = vld [vmem:[%s1662_s4 + $0x20] sm:$0xff] (!%p224_p9)  ;;  %v273_v41 = vld [vmem:[%s1662_s4 + $0x28] sm:$0xff] (!%p224_p9)  ;;  %v274_v43 = vld [vmem:[%s1662_s4 + $0x30] sm:$0xff] (!%p224_p9)  ;;  %vm592_vm8 = vcmask (!%p224_p9), 254976   ;;  %vm595_vm9 = vcmask (!%p224_p9), 261122   ;;  %vm598_vm10 = vcmask (!%p224_p9), 516352  }
  0x13   : > { %1096 = vmatpush1.bf16.msra.mxu0 (!%p224_p9), %v1095_v37  ;;  %v1101_v42 = vpack.c.bf16 (!%p224_p9), %v273_v41, %v272_v40  ;;  %v275_v44 = vld [vmem:[%s1662_s4 + $0x38] sm:$0xff] (!%p224_p9)  ;;  %v276_v46 = vld [vmem:[%s1662_s4 + $0x40] sm:$0xff] (!%p224_p9)  ;;  %v277_v47 = vld [vmem:[%s1662_s4 + $0x48] sm:$0xff] (!%p224_p9)  ;;  %593 = vst.msk [vmem:[#allocation2] sm:$0x3] (!%p224_p9), %vm592_vm8, %v1250_v0  ;;  %vm601_vm11 = vcmask (!%p224_p9), 523521  }
  0x14   : > { %1097 = vmatprep.subr.bf16.mxu0 (!%p224_p9), %v1254_v36  ;;  %v1104_v45 = vpack.c.bf16 (!%p224_p9), %v275_v44, %v274_v43  ;;  %v1107_v48 = vpack.c.bf16 (!%p224_p9), %v277_v47, %v276_v46  ;;  %v278_v49 = vld [vmem:[%s1662_s4 + $0x50] sm:$0xff] (!%p224_p9)  ;;  %v279_v50 = vld [vmem:[%s1662_s4 + $0x58] sm:$0xff] (!%p224_p9)  ;;  %v280_v52 = vld [vmem:[%s1662_s4 + $0x60] sm:$0xff] (!%p224_p9)  ;;  %594 = vst.msk [vmem:[#allocation2 + $0x20] sm:$0x3] (!%p224_p9), %vm592_vm8, %v1250_v0  ;;  %vm604_vm12 = vcmask (!%p224_p9), 785920  }
  0x15   : > { %s257_s9 = scalar_select %p256_p10, %s1318_s25, 1  ;;  %v1110_v51 = vpack.c.bf16 %v279_v50, %v278_v49  ;;  %v281_v53 = vld [vmem:[%s1662_s4 + $0x68] sm:$0xff]  ;;  %v282_v55 = vld [vmem:[%s1662_s4 + $0x70] sm:$0xff]  ;;  %v283_v56 = vld [vmem:[%s1662_s4 + $0x78] sm:$0xff]  ;;  %596 = vst.msk [vmem:[#allocation2 + $0x10] sm:$0xfc] %vm595_vm9, %v1250_v0 }
  0x16   : > { %v1113_v54 = vpack.c.bf16 %v281_v53, %v280_v52  ;;  %v1116_v57 = vpack.c.bf16 %v283_v56, %v282_v55  ;;  %v284_v58 = vld [vmem:[%s1662_s4 + $0x80] sm:$0xff]  ;;  %v285_v59 = vld [vmem:[%s1662_s4 + $0x88] sm:$0xff]  ;;  %v286_v62 = vld [vmem:[%s1662_s4 + $0x90] sm:$0xff]  ;;  %597 = vst.msk [vmem:[#allocation2 + $0x30] sm:$0xfc] %vm595_vm9, %v1250_v0  ;;  %vm607_vm13 = vcmask 1042176  }
  0x17   : > { %s1060_s10 = sshll.u32 %s257_s9, 3  ;;  %1099 = vmatpush1.bf16.msra.mxu0 %v1098_v39  ;;  %v1119_v60 = vpack.c.bf16 %v285_v59, %v284_v58  ;;  %v287_v63 = vld [vmem:[%s1662_s4 + $0x98] sm:$0xff]  ;;  %599 = vst.msk [vmem:[#allocation2] sm:$0x1] %vm598_vm10, %v1250_v0  ;;  %600 = vst.msk [vmem:[#allocation2 + $0x20] sm:$0x1] %vm598_vm10, %v1250_v0 }
  0x18   : > { %s263_s13 = scalar_lea.vmem %s1659_s1, %s1060_s10  ;;  %s259_s16 = scalar_lea.vmem %s1658_s0, %s1060_s10  ;;  %1100 = vmatprep.subr.bf16.mxu0 %v1254_v36  ;;  %602 = vst.msk [vmem:[#allocation2 + $0x10] sm:$0xfe] %vm601_vm11, %v1250_v0  ;;  %vm610_vm14 = vcmask 1048322   ;;  %603 = vst.msk [vmem:[#allocation2 + $0x30] sm:$0xfe] %vm601_vm11, %v1250_v0  ;;  %vm689_vm15 = vcmask 523264  }
  0x19   : > { %v1356_v1 = vld [vmem:[%s263_s13] sm:$0xff]  ;;  %605 = vst.msk [vmem:[#allocation2 + $0x10] sm:$0xff] %vm604_vm12, %v1250_v0  ;;  %606 = vst.msk [vmem:[#allocation2 + $0x30] sm:$0xff] %vm604_vm12, %v1250_v0  ;;  %s1255_s17 = smov 96   ;;  %s1256_s18 = smov 16  }
  0x1a   : > { %v1358_v2 = vld [vmem:[%s259_s16] sm:$0xff]  ;;  %1080 = vmatpush3.xpose.msk.msra.mxu1 %vm292_vm1, %v1356_v1  ;;  %v373_v3 = vmul.f32 %v1356_v1, %v1356_v1  ;;  %608 = vst.msk [vmem:[#allocation2] sm:$0x3] %vm607_vm13, %v1250_v0  ;;  %609 = vst.msk [vmem:[#allocation2 + $0x20] sm:$0x3] %vm607_vm13, %v1250_v0  ;;  %s1257_s19 = smov 48  }
  0x1b   : > { %v369_v4 = vmul.f32 %v1358_v2, %v1358_v2  ;;  %1084 = vmatprep.subr.mxu1 %v1250_v0  ;;  %v626_v32 = vrot.slane %v1358_v2, 7  ;;  %1102 = vmatpush1.bf16.msra.mxu0 %v1101_v42  ;;  %611 = vst.msk [vmem:[#allocation2 + $0x10] sm:$0xfc] %vm610_vm14, %v1250_v0  ;;  %612 = vst.msk [vmem:[#allocation2 + $0x30] sm:$0xfc] %vm610_vm14, %v1250_v0  ;;  %s1258_s20 = smov 80  }
  0x1c   : > { %v374_v5 = vsel %vm292_vm1, %v373_v3, 0.0  ;;  %1103 = vmatprep.subr.bf16.mxu0 %v1254_v36  ;;  %v1122_v3 = vpack.c.bf16 %v287_v63, %v286_v62  ;;  %s1259_s29 = smov 112   ;;  %s253_s9 = sand.u32 1, %s1240_s22  }
  0x1d   : > { %1082 = vmatmul.mubr.msk.f32.vlgmr.msra.gmra.mrb[0].mxu1 %vm292_vm1, %v1358_v2  ;;  %375 = vadd.xlane.f32.xlu0 %v374_v5  ;;  %v370_v6 = vsel %vm292_vm1, %v369_v4, 0.0  ;;  %v622_v4 = vrot.slane %v1358_v2, 6  ;;  %s1130_s10 = smul.u32 3, %s253_s9 }
  0x1e   : > { %1086 = vmatprep.mubr.msk.f32.mxu1 %vm1251_vm0, %v1250_v0  ;;  %1085 = vmatpush3.msra.mxu1 %v266_v7  ;;  %v289_v7 = vld [vmem:[%s1662_s4 + $0xa8] sm:$0xff]  ;;  %s1131_s11 = smul.u32 48, %s1318_s25  ;;  %s1261_s25 = smov [#allocation3]  }
  0x1f   : > { %1089 = vmatprep.subr.mxu1 %v1250_v0  ;;  %1105 = vmatpush1.bf16.msra.mxu0 %v1104_v45  ;;  %624 = vst.msk [vmem:[#allocation2] sm:$0xfc] %vm595_vm9, %v622_v4  ;;  %s255_s12 = scalar_lea.vmem [#allocation3], %s1130_s10 }
  0x20   : > { %1106 = vmatprep.subr.bf16.mxu0 %v1254_v36  ;;  %625 = vst.msk [vmem:[#allocation2 + $0x10] sm:$0x3] %vm592_vm8, %v622_v4  ;;  %s985_s13 = sshll.u32 %s255_s12, 4  ;;  %s1616_s16 = scalar_lea.hbm %s1664_s6, %s1131_s11  ;;  %s1618_s13 = int_to_ptr.vmem [resolvable:$true] %s985_s13 }
  0x21   : > { %371 = vadd.xlane.f32.xlu0 %v370_v6  ;;  %v288_v6 = vld [vmem:[%s1662_s4 + $0xa0] sm:$0xff] }
  0x22   : > { %v1125_v9 = vpack.c.bf16 %v289_v7, %v288_v6 }
  0x23   : > { %1108 = vmatpush1.bf16.msra.mxu0 %v1107_v48 }
  0x24   : > { %1109 = vmatprep.subr.bf16.mxu0 %v1254_v36 }
  0x27   : > { %1111 = vmatpush1.bf16.msra.mxu0 %v1110_v51 }
  0x28   : > { %1112 = vmatprep.subr.bf16.mxu0 %v1254_v36 }
  0x2b   : > { %1114 = vmatpush1.bf16.msra.mxu0 %v1113_v54 }
  0x2c   : > { %1115 = vmatprep.subr.bf16.mxu0 %v1254_v36 }
  0x2f   : > { %1117 = vmatpush1.bf16.msra.mxu0 %v1116_v57 }
  0x30   : > { %1118 = vmatprep.subr.bf16.mxu0 %v1254_v36 }
  0x33   : > { %1120 = vmatpush1.bf16.msra.mxu0 %v1119_v60 }
  0x34   : > { %1121 = vmatprep.subr.bf16.mxu0 %v1254_v36 }
  0x37   : > { %632 = vrot.lane.b32.xlu0 %v1358_v2, %s1252_s26  ;;  %1123 = vmatpush1.bf16.msra.mxu0 %v1122_v3 }
  0x38   : > { %1124 = vmatprep.subr.bf16.mxu0 %v1254_v36 }
  0x3b   : > { %1126 = vmatpush1.bf16.msra.mxu0 %v1125_v9 }
  0x3c   : > { %1127 = vmatprep.subr.bf16.mxu0 %v1254_v36 }
  0xaa   : > { %v376_v11 = vpop.xlane.xlu0 %375 }
  0xab   : > { %v383_v13 = vrot.slane %v376_v11, %v382_v12  ;;  %v290_v11 = vld [vmem:[%s1662_s4 + $0xb0] sm:$0xff]  ;;  %v291_v12 = vld [vmem:[%s1662_s4 + $0xb8] sm:$0xff] }
  0xae   : > { %v372_v14 = vpop.xlane.xlu0 %371 }
  0xaf   : > { %v397_v16 = vadd.f32 %v383_v13, %v372_v14  ;;  %v1128_v13 = vpack.c.bf16 %v291_v12, %v290_v11  ;;  %v656_v14 = vrot.slane %v1356_v1, 7 }
  0xb1   : > { %1129 = vmatpush1.bf16.msra.mxu0 %v1128_v13 }
  0xb2   : > { %v633_v5 = vpop.permute.xlu0 %632 }
  0xf0   : > { %v365_v15 = vpop.f32.mrb[0].mxu1 }
  0xf1   : > { %v398_v17 = vmul.f32 2.0, %v365_v15  ;;  %v1083_v18 = vpop.f32.mrb[1].mxu1 }
  0xf2   : > { %v651_v18 = vrot.slane %v1356_v1, 6 }
  0xf3   : > { %v399_v19 = vsub.f32 %v397_v16, %v398_v17 }
  0xf4   : > { %654 = vst.msk [vmem:[#allocation2 + $0x20] sm:$0xfc] %vm595_vm9, %v651_v18 }
  0xf5   : > { %v400_v20 = vmax.f32 %v399_v19, 0.0  ;;  %655 = vst.msk [vmem:[#allocation2 + $0x30] sm:$0x3] %vm592_vm8, %v651_v18  ;;  %vm904_vm8 = vcmask 916480  }
  0xf7   : > { %1182 = vrsqrt.f32 %v400_v20  ;;  %vm403_vm2 = vcmp.eq.f32.partialorder %v400_v20, inf  ;;  %v406_v23 = vand.u32 2147483648, %v400_v20  ;;  %vm405_vm3 = vcmp.eq.f32.partialorder %v400_v20, 0.0 }
 0x101   : > { %v1183_v21 = vpop.eup %1182 }
 0x102   : > { %v402_v22 = vmul.f32 %v1183_v21, %v400_v20 }
 0x104   : > { %v404_v24 = vsel %vm403_vm2, %v400_v20, %v402_v22  ;;  %vm817_vm2 = vcmask 123904  }
 0x105   : > { %v407_v25 = vsel %vm405_vm3, %v406_v23, %v404_v24  ;;  %vm791_vm3 = vcmask 1046528  }
 0x106   : > { %v408_v26 = vadd.f32 1.0, %v407_v25 }
 0x108   : > { %1184 = vrcp.f32 %v408_v26 }
 0x112   : > { %v1185_v27 = vpop.eup %1184 }
 0x113   : > { %v410_v28 = vmul.f32 %v1185_v27, %v408_v26 }
 0x115   : > { %v411_v29 = vsub.f32 2.0, %v410_v28 }
 0x117   : > { %v412_v30 = vmul.f32 %v1185_v27, %v411_v29 }
 0x119   : > { %413 = vxpose.xlu1.b32.start.end [1/1] (short) (narrow) %v412_v30, 8  ;;  %1087 = vmatmul.mubr.msk.f32.vlgmr.msra.gmra.mrb[2].mxu1 %vm445_vm4, %v412_v30 }
 0x11a   : > { %1090 = vmatpush3.msra.mxu1 %v267_v31  ;;  %1091 = vmatprep.mubr.msk.f32.mxu1 %vm1251_vm0, %v1250_v0  ;;  %vm815_vm0 = vcmask 130048  }
 0x137   : > { %627 = vrot.lane.b32.xlu1 %v626_v32, %s1253_s28 }
 0x13b   : > { %657 = vrot.lane.b32.xlu1 %v656_v14, %s1253_s28 }
 0x199   : > { %v429_v61 = vpop.trf.xlu1 }
 0x19a   : > { %1092 = vmatmul.mubr.msk.f32.vlgmr.msra.gmra.mrb[4].mxu1 %vm445_vm4, %v429_v61  ;;  %vm802_vm4 = vcmask 1045504  }
 0x1a9   : > { %v628_v2 = vpop.permute.xlu1 %627 }
 0x1aa   : > { %630 = vst.msk [vmem:[#allocation2] sm:$0xfe] %vm601_vm11, %v628_v2 }
 0x1ab   : > { %631 = vst.msk [vmem:[#allocation2 + $0x10] sm:$0x1] %vm598_vm10, %v628_v2 }
 0x1ac   : > { %635 = vst.msk [vmem:[#allocation2] sm:$0xff] %vm604_vm12, %v633_v5 }
 0x1ad   : > { %v658_v19 = vpop.permute.xlu1 %657 }
 0x1ae   : > { %660 = vst.msk [vmem:[#allocation2 + $0x20] sm:$0xfe] %vm601_vm11, %v658_v19 }
 0x1af   : > { %661 = vst.msk [vmem:[#allocation2 + $0x30] sm:$0x1] %vm598_vm10, %v658_v19 }
 0x1ec   : > { %v515_v0 = vpop.f32.mrb[2].mxu1 }
 0x1ed   : > { %v643_v15 = vrot.slane %v515_v0, 7  ;;  %647 = vrot.lane.b32.xlu0 %v515_v0, %s1253_s28  ;;  %v1088_v16 = vpop.f32.mrb[3].mxu1  ;;  %v637_v17 = vrot.slane %v515_v0, 6 }
 0x1ef   : > { %645 = vst.msk [vmem:[#allocation2 + $0x8] sm:$0xfe] %vm616_vm5, %v643_v15 }
 0x1f0   : > { %646 = vst.msk [vmem:[#allocation2 + $0x18] sm:$0x1] %vm613_vm7, %v643_v15 }
 0x1f1   : > { %638 = vrot.lane.b32.xlu0 %v637_v17, %s1255_s17 }
 0x1f5   : > { %662 = vrot.lane.b32.xlu0 %v1356_v1, %s1252_s26 }
 0x1f7   : > { %v684_v24 = vld [vmem:[#allocation2 + $0x18] sm:$0xff] }
 0x25f   : > { %v648_v20 = vpop.permute.xlu0 %647 }
 0x260   : > { %650 = vst.msk [vmem:[#allocation2 + $0x8] sm:$0xff] %vm619_vm6, %v648_v20 }
 0x263   : > { %v639_v21 = vpop.permute.xlu0 %638 }
 0x264   : > { %641 = vst.msk [vmem:[#allocation2] sm:$0xfc] %vm610_vm14, %v639_v21 }
 0x265   : > { %642 = vst.msk [vmem:[#allocation2 + $0x10] sm:$0x3] %vm607_vm13, %v639_v21 }
 0x267   : > { %v682_v22 = vld [vmem:[#allocation2 + $0x8] sm:$0xff]  ;;  %v663_v23 = vpop.permute.xlu0 %662 }
 0x268   : > { %1066 = vmatprep.mubr.msk.f32.mxu0 %vm689_vm15, %v682_v22  ;;  %665 = vst.msk [vmem:[#allocation2 + $0x20] sm:$0xff] %vm604_vm12, %v663_v23 }
 0x26b   : > { %v681_v1 = vld [vmem:[#allocation2] sm:$0xff] }
 0x26c   : > { %767 = vmatmul.mubr.f32.vlgmr.msra.gmra.mrb[0].mxu0 %v681_v1  ;;  %v683_v29 = vld [vmem:[#allocation2 + $0x10] sm:$0xff] }
 0x26d   : > { %v588_v25 = vpop.f32.mrb[4].mxu1  ;;  %1067 = vmatprep.mubr.msk.f32.mxu0 %vm689_vm15, %v684_v24 }
 0x26e   : > { %v667_v26 = vrot.slane %v588_v25, 6  ;;  %v673_v27 = vrot.slane %v588_v25, 7  ;;  %677 = vrot.lane.b32.xlu1 %v588_v25, %s1253_s28  ;;  %v1093_v28 = vpop.f32.mrb[5].mxu1 }
 0x270   : > { %675 = vst.msk [vmem:[#allocation2 + $0x28] sm:$0xfe] %vm616_vm5, %v673_v27  ;;  %772 = vmatmul.mubr.f32.gmra.mrb[2].mxu0 %v683_v29  ;;  %668 = vrot.lane.b32.xlu0 %v667_v26, %s1255_s17  ;;  %vm897_vm5 = vcmask 392192  }
 0x271   : > { %676 = vst.msk [vmem:[#allocation2 + $0x38] sm:$0x1] %vm613_vm7, %v673_v27  ;;  %vm902_vm7 = vcmask 785408  }
 0x278   : > { %v688_v34 = vld [vmem:[#allocation2 + $0x38] sm:$0xff] }
 0x2e0   : > { %v678_v30 = vpop.permute.xlu1 %677 }
 0x2e1   : > { %680 = vst.msk [vmem:[#allocation2 + $0x28] sm:$0xff] %vm619_vm6, %v678_v30  ;;  %vm900_vm6 = vcmask 654336  }
 0x2e2   : > { %v669_v31 = vpop.permute.xlu0 %668 }
 0x2e3   : > { %671 = vst.msk [vmem:[#allocation2 + $0x20] sm:$0xfc] %vm610_vm14, %v669_v31 }
 0x2e4   : > { %672 = vst.msk [vmem:[#allocation2 + $0x30] sm:$0x3] %vm607_vm13, %v669_v31 }
 0x2e8   : > { %v686_v32 = vld [vmem:[#allocation2 + $0x28] sm:$0xff] }
 0x2e9   : > { %1068 = vmatprep.mubr.msk.f32.mxu0 %vm689_vm15, %v686_v32 }
 0x2ea   : > { %v685_v33 = vld [vmem:[#allocation2 + $0x20] sm:$0xff] }
 0x2eb   : > { %777 = vmatmul.mubr.f32.gmra.mrb[4].mxu0 %v685_v33  ;;  %v687_v35 = vld [vmem:[#allocation2 + $0x30] sm:$0xff] }
 0x2ec   : > { %1069 = vmatprep.mubr.msk.f32.mxu0 %vm689_vm15, %v688_v34 }
 0x2ef   : > { %782 = vmatmul.mubr.f32.gmra.mrb[6].mxu0 %v687_v35 }
 0x33f   : > { %v768_v36 = vpop.f32.mrb[0].mxu0 }
 0x340   : > { %v770_v37 = vpop.f32.mrb[1].mxu0  ;;  %v792_v38 = vrot.slane %v768_v36, 1  ;;  %v803_v39 = vrot.slane %v768_v36, 2  ;;  %v816_v43 = vsel %vm815_vm0, %v768_v36, 0.0 }
 0x343   : > { %v773_v40 = vpop.f32.mrb[2].mxu0 }
 0x344   : > { %v793_v41 = vrot.slane %v773_v40, 1  ;;  %v804_v42 = vrot.slane %v773_v40, 2  ;;  %v818_v44 = vsel %vm817_vm2, %v773_v40, 0.0  ;;  %v775_v45 = vpop.f32.mrb[3].mxu0 }
 0x345   : > { %v1553_v46 = vadd.f32 %v818_v44, %v816_v43 }
 0x346   : > { %v794_v47 = vsel %vm791_vm3, %v792_v38, %v793_v41  ;;  %v805_v48 = vsel %vm802_vm4, %v803_v39, %v804_v42 }
 0x347   : > { %v800_v49 = vadd.f32 %v794_v47, %v768_v36  ;;  %v820_v30 = vrot.slane %v1553_v46, 4  ;;  %v922_v47 = vsub.s32 0, %v1379_v10 }
 0x349   : > { %v811_v50 = vadd.f32 %v805_v48, %v800_v49  ;;  %v821_v32 = vadd.f32 %v820_v30, %v1553_v46  ;;  %v930_v46 = vsub.s32 2, %v1379_v10  ;;  %v918_v49 = vld [vmem:[%s1663_s5] sm:$0x7] }
 0x34b   : > { %v1557_v51 = vmul.f32 0.33333334, %v811_v50  ;;  %v822_v34 = vrot.slane %v821_v32, 2  ;;  %v1260_v50 = vmov 1966171168  }
 0x34d   : > { %v838_v52 = vrot.slane %v1557_v51, 1  ;;  %v842_v53 = vrot.slane %v1557_v51, 2  ;;  %v846_v54 = vrot.slane %v1557_v51, 3  ;;  %v850_v55 = vrot.slane %v1557_v51, 4 }
 0x34e   : > { %v854_v56 = vrot.slane %v1557_v51, 5  ;;  %v858_v57 = vrot.slane %v1557_v51, 6  ;;  %v862_v58 = vrot.slane %v1557_v51, 7  ;;  %v823_v37 = vadd.f32 %v822_v34, %v821_v32 }
 0x34f   : > { %839 = vrot.lane.b32.xlu1 %v838_v52, %s1256_s18  ;;  %v943_v52 = vunpack.c.l.s4 %v1260_v50 }
 0x350   : > { %v824_v40 = vrot.slane %v823_v37, 1 }
 0x352   : > { %v825_v43 = vadd.f32 %v824_v40, %v823_v37 }
 0x353   : > { %843 = vrot.lane.b32.xlu1 %v842_v53, %s1253_s28  ;;  %v926_v53 = vsub.s32 1, %v1379_v10 }
 0x357   : > { %847 = vrot.lane.b32.xlu1 %v846_v54, %s1257_s19 }
 0x35b   : > { %851 = vrot.lane.b32.xlu1 %v850_v55, %s1252_s26 }
 0x35f   : > { %855 = vrot.lane.b32.xlu1 %v854_v56, %s1258_s20 }
 0x363   : > { %859 = vrot.lane.b32.xlu1 %v858_v57, %s1255_s17  ;;  %v835_v57 = vmul.f32 0.1, %v825_v43 }
 0x367   : > { %863 = vrot.lane.b32.xlu1 %v862_v58, %s1259_s29 }
 0x3be   : > { %v778_v59 = vpop.f32.mrb[4].mxu0 }
 0x3bf   : > { %v780_v60 = vpop.f32.mrb[5].mxu0  ;;  %v795_v61 = vrot.slane %v778_v59, 1  ;;  %v806_v62 = vrot.slane %v778_v59, 2  ;;  %v826_v2 = vsel %vm815_vm0, %v778_v59, 0.0 }
 0x3c1   : > { %v840_v27 = vpop.permute.xlu1 %839 }
 0x3c2   : > { %v783_v63 = vpop.f32.mrb[6].mxu0  ;;  %v895_v45 = vsel %vm815_vm0, %v1557_v51, %v840_v27 }
 0x3c3   : > { %v796_v3 = vrot.slane %v783_v63, 1  ;;  %v807_v4 = vrot.slane %v783_v63, 2  ;;  %v827_v5 = vsel %vm817_vm2, %v783_v63, 0.0  ;;  %v785_v6 = vpop.f32.mrb[7].mxu0 }
 0x3c4   : > { %v828_v7 = vadd.f32 %v827_v5, %v826_v2  ;;  %v927_v5 = vrot.slane %v918_v49, %v926_v53 }
 0x3c5   : > { %v797_v9 = vsel %vm791_vm3, %v795_v61, %v796_v3  ;;  %v808_v11 = vsel %vm802_vm4, %v806_v62, %v807_v4  ;;  %v844_v28 = vpop.permute.xlu1 %843  ;;  %v923_v61 = vrot.slane %v918_v49, %v922_v47  ;;  %v931_v62 = vrot.slane %v918_v49, %v930_v46 }
 0x3c6   : > { %v801_v12 = vadd.f32 %v797_v9, %v778_v59  ;;  %v829_v13 = vrot.slane %v828_v7, 4  ;;  %v896_v48 = vsel %vm292_vm1, %v895_v45, %v844_v28  ;;  %v944_v4 = vunpack.c.0.s8 %v943_v52 }
 0x3c8   : > { %v812_v14 = vadd.f32 %v808_v11, %v801_v12  ;;  %v830_v0 = vadd.f32 %v829_v13, %v828_v7 }
 0x3c9   : > { %v848_v29 = vpop.permute.xlu1 %847 }
 0x3ca   : > { %v814_v15 = vmul.f32 0.33333334, %v812_v14  ;;  %v831_v16 = vrot.slane %v830_v0, 2  ;;  %v898_v54 = vsel %vm897_vm5, %v896_v48, %v848_v29 }
 0x3cc   : > { %v867_v17 = vrot.slane %v814_v15, 1  ;;  %v832_v18 = vadd.f32 %v831_v16, %v830_v0  ;;  %v871_v20 = vrot.slane %v814_v15, 2  ;;  %v875_v23 = vrot.slane %v814_v15, 3 }
 0x3cd   : > { %v879_v1 = vrot.slane %v814_v15, 4  ;;  %v883_v24 = vrot.slane %v814_v15, 5  ;;  %v887_v25 = vrot.slane %v814_v15, 6  ;;  %v891_v26 = vrot.slane %v814_v15, 7  ;;  %v852_v31 = vpop.permute.xlu1 %851 }
 0x3ce   : > { %868 = vrot.lane.b32.xlu0 %v867_v17, %s1256_s18  ;;  %v833_v19 = vrot.slane %v832_v18, 1  ;;  %v899_v55 = vsel %vm689_vm15, %v898_v54, %v852_v31  ;;  %v947_v0 = vsub.s32 %v944_v4, %v1379_v10 }
 0x3d0   : > { %v834_v21 = vadd.f32 %v833_v19, %v832_v18 }
 0x3d1   : > { %v856_v35 = vpop.permute.xlu1 %855 }
 0x3d2   : > { %872 = vrot.lane.b32.xlu0 %v871_v20, %s1253_s28  ;;  %v836_v22 = vmul.f32 0.1, %v834_v21  ;;  %v901_v60 = vsel %vm900_vm6, %v899_v55, %v856_v35 }
 0x3d4   : > { %914 = vrot.lane.b32.xlu1 %v836_v22, %s1256_s18  ;;  %s1186_s18 = scalar_lea.vmem %s1618_s13, 48 }
 0x3d5   : > { %v860_v39 = vpop.permute.xlu1 %859  ;;  %p1187_p11 = scmp.ne.s32.totalorder %s1618_s13, %s1186_s18 }
 0x3d6   : > { %876 = vrot.lane.b32.xlu0 %v875_v23, %s1257_s19  ;;  %v903_v3 = vsel %vm902_vm7, %v901_v60, %v860_v39  ;;  %s1190_s19 = sshll.u32 %s1261_s25, 4  ;;  %s1191_s19 = int_to_ptr.vmem [resolvable:$false] %s1190_s19 }
 0x3d7   : > { %p1188_p12 = pnand %p1187_p11, %p1335_p5  ;;  %p1193_p0 = scmp.lt.s32.totalorder %s1618_s13, %s1191_s19 }
 0x3d9   : > { %v864_v42 = vpop.permute.xlu1 %863  ;;  %p1189_p13 = pneg %p1188_p12 }
 0x3da   : > { %880 = vrot.lane.b32.xlu0 %v879_v1, %s1252_s26  ;;  %v905_v6 = vsel %vm904_vm8, %v903_v3, %v864_v42 }
 0x3db   : > { %v935_v14 = vadd.f32 %v923_v61, %v905_v6 }
 0x3de   : > { %884 = vrot.lane.b32.xlu0 %v883_v24, %s1258_s20  ;;  %s1192_s20 = scalar_lea.vmem %s1191_s19, 96 }
 0x3df   : > { %p1194_p1 = scmp.lt.s32.totalorder %s1192_s20, %s1186_s18 }
 0x3e1   : > { %p1195_p2 = por %p1194_p1, %p1193_p0 }
 0x3e2   : > { %888 = vrot.lane.b32.xlu0 %v887_v25, %s1255_s17  ;;  %s971_s17 = scalar_lea.sflag [#allocation4], %s253_s9 }
 0x3e3   : > { %p1196_p3 = pnand %p1195_p2, %p1189_p13 }
 0x3e6   : > { %892 = vrot.lane.b32.xlu0 %v891_v26, %s1259_s29 }
 0x440   : > { %v869_v33 = vpop.permute.xlu0 %868 }
 0x441   : > { %v906_v51 = vsel %vm815_vm0, %v814_v15, %v869_v33 }
 0x444   : > { %v873_v36 = vpop.permute.xlu0 %872 }
 0x445   : > { %v907_v56 = vsel %vm292_vm1, %v906_v51, %v873_v36  ;;  %vm967_vm1 = vcmp.lt.s32.totalorder %v378_v8, 288 }
 0x446   : > { %v915_v58 = vpop.permute.xlu1 %914 }
 0x447   : > { %v917_v7 = vsel %vm815_vm0, %v835_v57, %v915_v58 }
 0x448   : > { %v877_v38 = vpop.permute.xlu0 %876  ;;  %v937_v15 = vadd.f32 %v931_v62, %v917_v7 }
 0x449   : > { %v908_v63 = vsel %vm897_vm5, %v907_v56, %v877_v38 }
 0x44a   : > { %v955_v18 = vrot.slane %v937_v15, %v947_v0 }
 0x44c   : > { %v881_v41 = vpop.permute.xlu0 %880 }
 0x44d   : > { %v909_v2 = vsel %vm689_vm15, %v908_v63, %v881_v41 }
 0x450   : > { %v885_v44 = vpop.permute.xlu0 %884 }
 0x451   : > { %v910_v9 = vsel %vm900_vm6, %v909_v2, %v885_v44 }
 0x454   : > { %v889_v59 = vpop.permute.xlu0 %888 }
 0x455   : > { %v911_v11 = vsel %vm902_vm7, %v910_v9, %v889_v59 }
 0x458   : > { %v893_v12 = vpop.permute.xlu0 %892 }
 0x459   : > { %v912_v13 = vsel %vm904_vm8, %v911_v11, %v893_v12 }
 0x45a   : > { %v936_v16 = vadd.f32 %v927_v5, %v912_v13 }
 0x45c   : > { %v941_v17 = vcombine.low %v935_v14, %v936_v16 }
 0x45e   : > { %v948_v19 = vrot.slane %v941_v17, %v947_v0 }
 0x460   : > { %v956_v20 = vcombine.low %v948_v19, %v955_v18 }
 0x462   : > { %v963_v21 = vrot.slane %v956_v20, %v947_v0 }
 0x464   : > { %969 = vst.msk [vmem:[%s255_s12] sm:$0x7] %vm967_vm1, %v963_v21 }
 0x465   : > { %1199 = shalt.err (!%p1196_p3)
}
 0x466   : > { %s1200_s29 = scalar_lea.hbm %s1616_s16, 48  ;;  %s1204_s9 = scalar_lea.hbm %s1664_s6, 96 }
 0x467   : > { %p1201_p4 = scmp.ne.s32.totalorder %s1616_s16, %s1200_s29  ;;  %p1205_p9 = scmp.lt.u32.totalorder %s1616_s16, %s1664_s6 }
 0x468   : > { %p1206_p10 = scmp.lt.u32.totalorder %s1204_s9, %s1200_s29  ;;  %p1208_p12 = scmp.lt.u32.totalorder %s1200_s29, %s1616_s16 }
 0x469   : > { %p1202_p7 = pnand %p1201_p4, %p1335_p5 }
 0x46a   : > { %p1207_p11 = por %p1206_p10, %p1205_p9 }
 0x46b   : > { %p1203_p8 = pneg %p1202_p7 }
 0x46c   : > { %p1209_p13 = por %p1208_p12, %p1207_p11 }
 0x46e   : > { %p1210_p0 = pnand %p1209_p13, %p1203_p8 }
 0x470   : > { %1213 = shalt.err (!%p1210_p0)
}
 0x471   : > { %1132 = dma.vmem_to_hbm [thread:$0]  (%p1335_p5), %s1618_s13, 48, %s1616_s16, %s971_s17  }
 0x472 PF: > { %p1138_p1 = scmp.ge.s32.totalorder %s1248_s24, 2  ;;  %s997_s12 = sand.u32 1, %s1236_s21  }
 0x473   : > { %s998_s14 = scalar_lea.sflag [#allocation4], %s997_s12 }
 0x474   : > { %p1135_p2 = pnand %p1138_p1, %p1339_p6 }
 0x476   : > { %1231 = dma.done.wait (!%p1135_p2), %s998_s14, 48  }
 0x477   : > { %1233 = vsyncadd (!%p1135_p2), %s998_s14, 4294967248  ;;  %p16_p3 = scmp.ge.s32.totalorder %s1322_s27, 4   ;;  %s1667_s21 = smov %s1240_s22 }
 0x478   : > { %s1668_s22 = smov %s1244_s23  ;;  %s1669_s23 = smov %s1333_s30 }
 0x479   : > { %s1670_s24 = smov %s1322_s27  ;;  %18 = sbr.rel (!%p16_p3) target bundleno = 3 (0x3), region = 83 }
 0x480   :  { %1003 = vsyncpa [#allocation4], 1 }
 0x481   :  { %1005 = vsyncpa [#allocation4 + $0x1], 1 }

</bundles_post_ra>
